<compile_context>
chip_gen: v6e
topology: v6e:2x2x1
jax: 0.10.0
libtpu: 0.0.40
codegen_flags: <defaults>
</compile_context>

<pallas_src>
import functools

import jax
import jax.numpy as jnp
from jax import lax
from jax.experimental import pallas as pl
from jax.experimental.pallas import tpu as pltpu


def _round_up(x, n):
    return (x + n - 1) // n * n


def _naive_header_kernel(x_ref, w_ref, scale_ref, labels_ref, out_ref, *,
                         margin_times_s, tile_c, matmul_dtype):
    # x_ref:      [B, E]        matmul dtype (bf16), resident
    # w_ref:      [TILE_C, E]   stored dtype, streamed; cast in-kernel
    # scale_ref:  [1, TILE_C]   f32, precomputed  s * rsqrt(max(||w||^2,1e-24))
    # labels_ref: [B, 1]        int32
    # out_ref:    [B, TILE_C]   f32
    x = x_ref[...]
    w = w_ref[...].astype(matmul_dtype)

    # Raw logits: contract over E without materializing w.T (MXU, f32 acc).
    raw = lax.dot_general(
        x, w,
        dimension_numbers=(((1,), (1,)), ((), ())),
        preferred_element_type=jnp.float32)                     # [B, TILE_C]

    # Fold the L2 normalization and `s` in one broadcasted post-scale.
    logits = raw * scale_ref[...]                                # == s * (x @ w_n.T)

    # Margin at the target class (pre-scale margin m -> m*s post-scale).
    # Assumes labels are in [0, C) or exactly -1 (same contract as the module).
    labels = labels_ref[...]                                     # [B, 1] int32
    col0 = pl.program_id(0) * tile_c
    col = col0 + lax.broadcasted_iota(jnp.int32, logits.shape, 1)
    hit = (col == labels) & (labels != jnp.int32(-1))
    out_ref[...] = jnp.where(hit, logits - jnp.float32(margin_times_s),
                             logits).astype(out_ref.dtype)


def _vmem_budget_bytes():
    """Scoped-VMEM budget per generation (v7x has only 64 MiB per TensorCore)."""
    try:
        kind = jax.devices()[0].device_kind.lower()
    except Exception:
        kind = ""
    if "v5" in kind or "v6" in kind:
        return 100 * 1024 * 1024     # 128 MiB physical -> generous scoped limit
    return 56 * 1024 * 1024          # v7x / unknown: stay under 64 MiB


def _choose_tile_c(C, B, E, requested, w_bytes, x_bytes, out_bytes, budget):
    """Pick a lane-dense (multiple-of-128) class tile that fits the VMEM budget
    and leaves >=2 tiles when C allows (so both v7x TensorCores get work)."""
    if C <= 128:
        return C                                   # single full-extent tile
    tile_c = max(128, _round_up(min(requested, C), 128))
    if tile_c >= C:
        tile_c = max(128, _round_up(pl.cdiv(C, 2), 128))
        if tile_c >= C:                            # C in (128, 256]: can't split
            return C

    def footprint(tc):
        return (2 * B * E * x_bytes                # resident x (worst case 2 bufs)
                + 2 * tc * E * w_bytes             # streamed weight, double-buffered
                + 2 * B * tc * out_bytes           # output tile, double-buffered
                + 2 * tc * 4 + 2 * B * 4)          # scale + labels

    while tile_c > 128 and footprint(tile_c) > budget:
        tile_c -= 128
    return tile_c


def naive_header(x, weight, labels, *, m=8 ** 0.5, s=4.0,
                 tile_c=1024, matmul_dtype=jnp.bfloat16,
                 out_dtype=jnp.float32, scale=None):
    """x: [B, E] f32, weight: [C, E], labels: [B] int32 (-1 = ignore).

    `scale` (optional): precomputed f32 [C] per-class scale
    s * rsqrt(max(||w_row||^2, 1e-24)); pass it (plus a persistently bf16
    weight) to avoid recomputing it and re-casting the weight every step.
    """
    B, E = x.shape
    C, E2 = weight.shape
    assert E == E2

    # Per-class scale in f32 from the original weight: matches F.normalize's
    # eps exactly and removes all norm work from the per-tile kernel body.
    if scale is None:
        w32 = weight.astype(jnp.float32)
        sumsq = jnp.sum(w32 * w32, axis=-1)
        scale = jnp.float32(s) * lax.rsqrt(jnp.maximum(sumsq, jnp.float32(1e-24)))
    scale = scale.reshape(1, C).astype(jnp.float32)

    budget = _vmem_budget_bytes()
    tile_c = _choose_tile_c(
        C, B, E, tile_c,
        w_bytes=jnp.dtype(weight.dtype).itemsize,
        x_bytes=jnp.dtype(matmul_dtype).itemsize,
        out_bytes=jnp.dtype(out_dtype).itemsize,
        budget=budget)
    grid = (pl.cdiv(C, tile_c),)                   # ragged last tile is fine

    x_mm = x.astype(matmul_dtype)
    labels2d = labels.reshape(B, 1).astype(jnp.int32)

    kernel = functools.partial(
        _naive_header_kernel,
        margin_times_s=float(m) * float(s),
        tile_c=tile_c,
        matmul_dtype=matmul_dtype)

    # TODO(synk): optional pl.Buffered(3) on the weight spec / int8(fp8 on v7x)
    # weight path for the strongly weight-bandwidth-bound (tiny-B, huge-C) case.
    out = pl.pallas_call(
        kernel,
        out_shape=jax.ShapeDtypeStruct((B, C), out_dtype),
        grid=grid,
        in_specs=[
            pl.BlockSpec((B, E), lambda c: (0, 0)),        # x: resident
            pl.BlockSpec((tile_c, E), lambda c: (c, 0)),   # weight: streamed over C
            pl.BlockSpec((1, tile_c), lambda c: (0, c)),   # precomputed per-class scale
            pl.BlockSpec((B, 1), lambda c: (0, 0)),        # labels: resident
        ],
        out_specs=pl.BlockSpec((B, tile_c), lambda c: (0, c)),
        compiler_params=pltpu.CompilerParams(
            # class tiles are independent -> shardable over v7x's 2 TensorCores
            dimension_semantics=("parallel",),
            vmem_limit_bytes=budget,
        ),
    )(x_mm, weight, scale, labels2d)
    return out


def _reference(x, weight, labels, m, s):
    norm = jnp.maximum(jnp.linalg.norm(weight, axis=-1, keepdims=True), 1e-12)
    w = weight / norm
    logits = x @ w.T
    col = jnp.arange(weight.shape[0])[None, :]
    hit = (col == labels[:, None]) & (labels[:, None] != -1)
    logits = jnp.where(hit, logits - m, logits)
    return logits * s


if __name__ == "__main__":
    key = jax.random.PRNGKey(0)
    k_w, k_x, k2_w, k2_x, k2_l = jax.random.split(key, 5)
    m, s = 8 ** 0.5, 4.0

    # --- Test 1: tiny shapes matching the module defaults (single class tile) ---
    num_classes, emb_size, batch = 16, 32, 8
    weight = jax.random.normal(k_w, (num_classes, emb_size), jnp.float32) * 0.01
    x = jax.random.normal(k_x, (batch, emb_size), jnp.float32)
    labels = jnp.array([3, -1, 7, 0, 15, -1, 2, 9], dtype=jnp.int32)

    out = jax.block_until_ready(naive_header(x, weight, labels, m=m, s=s))
    ref = _reference(x, weight, labels, m, s)
    assert out.shape == (batch, num_classes)
    # bf16 matmul operands (f32 accumulation) -> bf16-level tolerance vs f32 ref.
    assert jnp.allclose(out, ref, atol=8e-2, rtol=2e-2), \
        float(jnp.max(jnp.abs(out - ref)))

    # --- Test 2: multi-tile class grid with a ragged last tile ---
    C2, E2, B2 = 300, 128, 16
    weight2 = jax.random.normal(k2_w, (C2, E2), jnp.float32) * 0.01
    x2 = jax.random.normal(k2_x, (B2, E2), jnp.float32)
    labels2 = jax.random.randint(k2_l, (B2,), 0, C2, dtype=jnp.int32)
    labels2 = labels2.at[::5].set(-1)

    out2 = jax.block_until_ready(naive_header(x2, weight2, labels2, m=m, s=s))
    ref2 = _reference(x2, weight2, labels2, m, s)
    assert out2.shape == (B2, C2)
    assert jnp.allclose(out2, ref2, atol=8e-2, rtol=2e-2), \
        float(jnp.max(jnp.abs(out2 - ref2)))

    print("KERNEL_OK")
</pallas_src>

<mosaic_0001>
module attributes {stable_mosaic.version = 11 : i64} {
  func.func @_naive_header_kernel(%arg0: i32, %arg1: memref<8x32xbf16, #tpu.memory_space<vmem>>, %arg2: memref<16x32xf32, #tpu.memory_space<vmem>>, %arg3: memref<1x16xf32, #tpu.memory_space<vmem>>, %arg4: memref<8x1xi32, #tpu.memory_space<vmem>>, %arg5: memref<8x16xf32, #tpu.memory_space<vmem>>) attributes {dimension_semantics = [#tpu.dimension_semantics<parallel>], iteration_bounds = array<i64: 1>, scalar_prefetch = 0 : i64, scratch_operands = 0 : i64, tpu.core_type = #tpu.core_type<tc>, window_params = [{pipeline_mode = #tpu.pipeline_mode<synchronous>, transform_indices = @transform_0, window_bounds = array<i64: 8, 32>}, {transform_indices = @transform_1, window_bounds = array<i64: 16, 32>}, {transform_indices = @transform_2, window_bounds = array<i64: 1, 16>}, {pipeline_mode = #tpu.pipeline_mode<synchronous>, transform_indices = @transform_3, window_bounds = array<i64: 8, 1>}, {transform_indices = @transform_4, window_bounds = array<i64: 8, 16>}]} {
    %c0 = arith.constant 0 : index
    %c0_0 = arith.constant 0 : index
    %0 = vector.load %arg1[%c0, %c0_0] : memref<8x32xbf16, #tpu.memory_space<vmem>>, vector<8x32xbf16>
    %c0_1 = arith.constant 0 : index
    %c0_2 = arith.constant 0 : index
    %1 = vector.load %arg2[%c0_1, %c0_2] : memref<16x32xf32, #tpu.memory_space<vmem>>, vector<16x32xf32>
    %2 = arith.truncf %1 : vector<16x32xf32> to vector<16x32xbf16>
    %cst = arith.constant dense<0.000000e+00> : vector<8x16xf32>
    %3 = tpu.matmul %0, %2, %cst {dimension_numbers = #tpu.dot_dimension_numbers<[1], [1], [0], [0], [0, 0, 1, 0], [], []>} : vector<8x32xbf16>, vector<16x32xbf16>, vector<8x16xf32> -> vector<8x16xf32>
    %c0_3 = arith.constant 0 : index
    %c0_4 = arith.constant 0 : index
    %4 = vector.load %arg3[%c0_3, %c0_4] : memref<1x16xf32, #tpu.memory_space<vmem>>, vector<1x16xf32>
    %5 = vector.broadcast %4 : vector<1x16xf32> to vector<8x16xf32>
    %6 = arith.mulf %3, %5 : vector<8x16xf32>
    %c0_5 = arith.constant 0 : index
    %c0_6 = arith.constant 0 : index
    %7 = vector.load %arg4[%c0_5, %c0_6] : memref<8x1xi32, #tpu.memory_space<vmem>>, vector<8x1xi32>
    %c16_i32 = arith.constant 16 : i32
    %8 = arith.muli %arg0, %c16_i32 : i32
    %9 = tpu.iota {dimensions = array<i32: 1>} : vector<8x16xi32>
    %10 = vector.broadcast %8 : i32 to vector<8x16xi32>
    %11 = arith.addi %10, %9 : vector<8x16xi32>
    %12 = vector.broadcast %7 : vector<8x1xi32> to vector<8x16xi32>
    %13 = arith.cmpi eq, %11, %12 : vector<8x16xi32>
    %c-1_i32 = arith.constant -1 : i32
    %14 = vector.broadcast %c-1_i32 : i32 to vector<8x1xi32>
    %15 = arith.cmpi ne, %7, %14 : vector<8x1xi32>
    %16 = vector.broadcast %15 : vector<8x1xi1> to vector<8x16xi1>
    %17 = arith.andi %13, %16 : vector<8x16xi1>
    %cst_7 = arith.constant 11.3137083 : f32
    %18 = vector.broadcast %cst_7 : f32 to vector<8x16xf32>
    %19 = arith.subf %6, %18 : vector<8x16xf32>
    %20 = arith.select %17, %19, %6 : vector<8x16xi1>, vector<8x16xf32>
    %c0_8 = arith.constant 0 : index
    %c0_9 = arith.constant 0 : index
    %21 = vector.load %arg5[%c0_8, %c0_9] : memref<8x16xf32, #tpu.memory_space<vmem>>, vector<8x16xf32>
    tpu.vector_store %arg5[%c0_8, %c0_9], %20 {strides = array<i32>} : memref<8x16xf32, #tpu.memory_space<vmem>>, vector<8x16xf32>,
    return
  }
  func.func @transform_0(%arg0: i32) -> (i32, i32) {
    %c0_i32 = arith.constant 0 : i32
    %c0_i32_0 = arith.constant 0 : i32
    %c0_i32_1 = arith.constant 0 : i32
    return %c0_i32, %c0_i32_0 : i32, i32
  }
  func.func @transform_1(%arg0: i32) -> (i32, i32) {
    %c0_i32 = arith.constant 0 : i32
    %c0_i32_0 = arith.constant 0 : i32
    return %arg0, %c0_i32 : i32, i32
  }
  func.func @transform_2(%arg0: i32) -> (i32, i32) {
    %c0_i32 = arith.constant 0 : i32
    %c0_i32_0 = arith.constant 0 : i32
    return %c0_i32, %arg0 : i32, i32
  }
  func.func @transform_3(%arg0: i32) -> (i32, i32) {
    %c0_i32 = arith.constant 0 : i32
    %c0_i32_0 = arith.constant 0 : i32
    %c0_i32_1 = arith.constant 0 : i32
    return %c0_i32, %c0_i32_0 : i32, i32
  }
  func.func @transform_4(%arg0: i32) -> (i32, i32) {
    %c0_i32 = arith.constant 0 : i32
    %c0_i32_0 = arith.constant 0 : i32
    return %c0_i32, %arg0 : i32, i32
  }
}

</mosaic_0001>

<bundles_post_ra>
// kernel: tpu_custom_call.1
= control target key start
LH: loop header
LB: loop body
LE: loop exit
PB: predicated region body
PF: predicated region fallthrough
CT: control target
= control target key end

     0   :  { %9 = vsyncpa [#allocation3], 0  ;;  %s238_s0 = inlined_call_operand.vmem [shape: bf16[8,32], index: 0, kind: input, shape index: {}]   ;;  %s239_s1 = inlined_call_operand.hbm [shape: f32[16,32], index: 1, kind: input, shape index: {}]   ;;  %s240_s2 = inlined_call_operand.vmem [shape: f32[1,16], index: 2, kind: input, shape index: {}]   ;;  %s241_s3 = inlined_call_operand.vmem [shape: s32[8,1], index: 3, kind: input, shape index: {}]   ;;  %s242_s4 = inlined_call_operand.hbm [shape: f32[8,16], index: 4, kind: output, shape index: {}]  }
   0x1   :  { %10 = vsyncpa [#allocation4], 0  ;;  %s191_s15 = smov [#allocation2]  }
   0x2   :  { %s18_s16 = sshll.u32 %s191_s15, 4  ;;  %s19_s16 = int_to_ptr.vmem [resolvable:$true] %s18_s16 }
   0x3   :  { %s155_s17 = scalar_lea.vmem %s19_s16, 256  ;;  %p160_p1 = scmp.lt.s32.totalorder %s19_s16, %s19_s16 }
   0x4   :  { %p156_p0 = scmp.ne.s32.totalorder %s19_s16, %s155_s17  ;;  %p161_p2 = scmp.lt.s32.totalorder %s155_s17, %s155_s17 }
   0x6   :  { %p162_p3 = por %p161_p2, %p160_p1 }
   0x8   :  { %p163_p4 = pnand %p162_p3, %p156_p0 }
   0xa   :  { %166 = shalt.err (!%p163_p4)
}
   0xb   :  { %s192_s18 = smov 128   ;;  %s193_s19 = smov 8  }
   0xc   :  { %24 = dma.hbm_to_vmem [thread:$0]  %s239_s1, 256, %s19_s16, [#allocation3], %s192_s18, %s192_s18, %s193_s19  }
   0xd   :  { %187 = dma.done.wait [#allocation3], 256  }
   0xe   :  { %188 = vsyncadd [#allocation3], 4294967040  ;;  %v194_v0 = vmov 0.0   ;;  %vm195_vm0 = vmmov 0   ;;  %v196_v1 = vmov 0   ;;  %v34_v2 = vld [vmem:[#allocation2] sm:$0xff]  ;;  %v94_v10 = vlaneseq }
   0xf   :  { %133 = vmatprep.subr.bf16.mxu0 %v194_v0  ;;  %135 = vmatprep.mubr.msk.bf16.mxu0 %vm195_vm0, %v194_v0  ;;  %v35_v3 = vld [vmem:[#allocation2 + $0x8] sm:$0xff]  ;;  %vm37_vm1 = vcmask 261120   ;;  %v92_v5 = vld [vmem:[%s241_s3] sm:$0xff]  ;;  %s197_s3 = smov [#allocation5]   ;;  %vm111_vm5 = vcmask 130048  }
  0x10   :  { %146 = vset.pattern.permute.xlu0 %v196_v1  ;;  %v36_v4 = vpack.c.bf16 %v35_v3, %v34_v2  ;;  %vm102_vm2 = vcmp.ne.s32.totalorder %v92_v5, 4294967295  ;;  %v33_v8 = vld [vmem:[%s238_s0] sm:$0xf]  ;;  %v95_v11 = vand.u32 127, %v94_v10  ;;  %s119_s27 = sshll.u32 %s197_s3, 4  ;;  %s120_s27 = int_to_ptr.vmem [resolvable:$true] %s119_s27 }
  0x11   :  { %99 = vperm.xlu0 %146, %v92_v5   ;;  %v103_v7 = vsel %vm102_vm2, 1, %v196_v1  ;;  %v129_v13 = vld [vmem:[%s240_s2] ss:$0 sm:$0xff]  ;;  %s167_s0 = scalar_lea.vmem %s120_s27, 128  ;;  %p172_p6 = scmp.lt.s32.totalorder %s120_s27, %s120_s27 }
  0x12   :  { %v42_v6 = vsel %vm37_vm1, %v36_v4, 0  ;;  %p168_p5 = scmp.ne.s32.totalorder %s120_s27, %s167_s0  ;;  %p173_p7 = scmp.lt.s32.totalorder %s167_s0, %s167_s0 }
  0x13   :  { %134 = vmatpush3.bf16.xpose.msra.mxu0 %v42_v6 }
  0x14   :  { %p174_p8 = por %p173_p7, %p172_p6 }
  0x15   :  { %105 = vperm.xlu0 %146, %v103_v7  }
  0x16   :  { %p175_p9 = pnand %p174_p8, %p168_p5 }
  0x1a   :  { %136 = vmatmul.mubr.msk.bf16.vlgmr.msra.gmra.mxu0 %vm37_vm1, %v33_v8 }
  0x8c   :  { %v100_v9 = vpop.permute.xlu0 %99 }
  0x8d   :  { %vm101_vm3 = vcmp.eq.s32.totalorder %v95_v11, %v100_v9 }
  0x90   :  { %v106_v12 = vpop.permute.xlu0 %105 }
  0x91   :  { %vm107_vm4 = vcmp.eq.s32.totalorder %v106_v12, 1 }
  0x92   :  { %vm108_vm6 = vmand %vm101_vm3, %vm107_vm4 }
  0xda   :  { %v78_v14 = vpop.f32.mrf.mxu0 }
  0xdb   :  { %v91_v15 = vmul.f32 %v129_v13, %v78_v14 }
  0xdc   :  { %v137_v16 = vpop.f32.mrf.mxu0 }
  0xdd   :  { %v130_v17 = vadd.f32 -11.313708, %v91_v15 }
  0xde   :  { %v81_v18 = vpop.f32.mrf.mxu0 }
  0xdf   :  { %v110_v19 = vsel %vm108_vm6, %v130_v17, %v91_v15 }
  0xe0   :  { %v138_v20 = vpop.f32.mrf.mxu0  ;;  %112 = vst.msk [vmem:[#allocation5] sm:$0xff] %vm111_vm5, %v110_v19 }
  0xe1   :  { %178 = shalt.err (!%p175_p9)
}
  0xe2   :  { %122 = dma.vmem_to_hbm [thread:$0]  %s120_s27, 128, %s242_s4, [#allocation4]  }
  0xe3   :  { %189 = dma.done.wait [#allocation4], 128  }
  0xe4   :  { %190 = vsyncadd [#allocation4], 4294967168 }
  0xe5   :  { %126 = vsyncpa [#allocation3], 1 }
  0xe6   :  { %127 = vsyncpa [#allocation4], 1 }

</bundles_post_ra>
